<compile_context>
chip_gen: v6e
topology: v6e:2x2x1
jax: 0.10.0
libtpu: 0.0.40
codegen_flags: <defaults>
</compile_context>

<pallas_src>
import functools

import jax
import jax.numpy as jnp
from jax import lax
from jax.experimental import pallas as pl
from jax.experimental.pallas import tpu as pltpu


def _round_up(x, m):
    return ((x + m - 1) // m) * m


def gcn_fused_kernel(x_ref, dinv_ref, adj_ref, w_ref, gamma_ref, beta_ref,
                     o_ref, xw_ref, sum_ref, sumsq_ref, *,
                     n_nodes, tm, eps, adj_resident):
    l = pl.program_id(0)            # layer index (outer, sequential)
    i = pl.program_id(1)            # adjacency row-tile index (inner, sequential: BN reduction)
    n_tiles = pl.num_programs(1)

    @pl.when(i == 0)
    def _start_layer():
        sum_ref[...] = jnp.zeros_like(sum_ref)
        sumsq_ref[...] = jnp.zeros_like(sumsq_ref)
        w = w_ref[0]                 # (f_pad, f_pad) bf16 -> fast MXU path, f32 acc

        @pl.when(l == 0)
        def _layer0_xw():
            # Layer 0 input: original (bf16) node features.
            xw = jnp.dot(x_ref[...], w, preferred_element_type=jnp.float32)
            xw_ref[...] = (xw * dinv_ref[...]).astype(xw_ref.dtype)

        @pl.when(l > 0)
        def _later_xw():
            # Later layers: previous layer's normalized+ReLU'd activations, still
            # VMEM-resident in the output block.
            inp = o_ref[...].astype(jnp.bfloat16)
            xw = jnp.dot(inp, w, preferred_element_type=jnp.float32)
            xw_ref[...] = (xw * dinv_ref[...]).astype(xw_ref.dtype)

    # H row tile:  h = d^{-1/2}_rows * ((A + I)_tile @ (d^{-1/2} X W))   (bf16 MXU, f32 acc)
    row0 = pl.multiple_of(i * tm, tm)
    if adj_resident:
        # Whole int8 adjacency resident in VMEM (DMA'd once for all layers); slice the tile.
        a_tile = adj_ref[pl.ds(row0, tm), :].astype(jnp.bfloat16)
    else:
        # Streamed (tm, n_pad) int8 row tile; widen to bf16 after the (halved) HBM load.
        a_tile = adj_ref[...].astype(jnp.bfloat16)

    h = jnp.dot(a_tile, xw_ref[...], preferred_element_type=jnp.float32)
    h = h * dinv_ref[pl.ds(row0, tm), :]
    o_ref[pl.ds(row0, tm), :] = h
    # Single-pass BatchNorm statistics (padded rows of h are exactly zero; divide by true N).
    sum_ref[...] += jnp.sum(h, axis=0, keepdims=True)
    sumsq_ref[...] += jnp.sum(h * h, axis=0, keepdims=True)

    @pl.when(i == n_tiles - 1)
    def _finish_layer():
        # BatchNorm1d (training-mode batch statistics, biased variance) + ReLU, in place
        # over the whole VMEM-resident activation slab.
        inv_n = 1.0 / n_nodes
        mean = sum_ref[...] * inv_n
        var = jnp.maximum(sumsq_ref[...] * inv_n - mean * mean, 0.0)
        rstd = lax.rsqrt(var + eps)
        scale = gamma_ref[0] * rstd
        shift = beta_ref[0] - mean * scale
        o_ref[...] = jnp.maximum(o_ref[...] * scale + shift, 0.0)


def _vmem_estimate_bytes(n_pad, f_pad, tm, num_layers, adj_resident):
    """Conservative VMEM estimate: count 2 buffers for every pipelined block."""
    b = 0
    b += 2 * n_pad * f_pad * 4          # resident output slab (f32)
    b += 2 * n_pad * f_pad * 2          # resident X slab (bf16)
    b += 2 * n_pad * 4                  # d^{-1/2}
    b += 2 * f_pad * f_pad * 2          # W_l (bf16, double-buffered across layers)
    b += 4 * f_pad * 4                  # gamma_l, beta_l
    b += n_pad * f_pad * 2              # xw scratch (bf16)
    b += 2 * f_pad * 4                  # BN sum / sumsq scratch
    if adj_resident:
        b += 2 * n_pad * n_pad          # resident int8 adjacency
    else:
        b += 2 * tm * n_pad             # streamed int8 adjacency row tile
    return b


def gcn_forward(x, edge_index, params, *, tm=128, eps=1e-5):
    """Fused GCN forward.  params: list of (W [F_in,F_out], gamma [F_out], beta [F_out])."""
    n, f_in = x.shape
    f_out = params[0][0].shape[1]
    num_layers = len(params)

    f_pad = _round_up(max(f_in, f_out), 128)
    n_pad = _round_up(n, tm)
    n_tiles = n_pad // tm

    # --- glue (plain JAX): dense 0/1 (A + I) and d^{-1/2} per node ---------------------------
    # TODO(synk): edge_index -> dense adjacency scatter stays in JAX glue (data-dependent scatter).
    src, tgt = edge_index[0], edge_index[1]
    a = jnp.zeros((n, n), jnp.float32).at[tgt, src].set(1.0)   # edge j -> i aggregates at node i
    a = jnp.maximum(a, jnp.eye(n, dtype=jnp.float32))          # add remaining self loops
    deg = jnp.sum(a, axis=1)
    d_inv_sqrt = jnp.where(deg > 0, lax.rsqrt(deg), 0.0)

    # int8 (A+I) in HBM: half the dominant HBM stream vs bf16; widened to bf16 in-kernel.
    adj_pad = jnp.zeros((n_pad, n_pad), jnp.int8).at[:n, :n].set(a.astype(jnp.int8))
    dinv_pad = jnp.zeros((n_pad, 1), jnp.float32).at[:n, 0].set(d_inv_sqrt)
    x_pad = jnp.zeros((n_pad, f_pad), jnp.bfloat16).at[:n, :f_in].set(x.astype(jnp.bfloat16))

    w_all, g_all, b_all = [], [], []
    for (w, gamma, beta) in params:
        fi, fo = w.shape
        w_all.append(jnp.zeros((f_pad, f_pad), jnp.bfloat16).at[:fi, :fo].set(w.astype(jnp.bfloat16)))
        g_all.append(jnp.zeros((1, f_pad), jnp.float32).at[0, :fo].set(gamma.reshape(-1)))
        b_all.append(jnp.zeros((1, f_pad), jnp.float32).at[0, :fo].set(beta.reshape(-1)))
    w_all = jnp.stack(w_all)   # [L, f_pad, f_pad] bf16
    g_all = jnp.stack(g_all)   # [L, 1, f_pad]
    b_all = jnp.stack(b_all)   # [L, 1, f_pad]

    # Adjacency residency gate + per-generation-safe VMEM budget (<= 56 MiB fits v7x's 64 MiB).
    resident_budget = 44 * 1024 * 1024
    adj_resident = _vmem_estimate_bytes(n_pad, f_pad, tm, num_layers, True) <= resident_budget
    vmem_needed = _vmem_estimate_bytes(n_pad, f_pad, tm, num_layers, adj_resident)
    vmem_limit = min(56 * 1024 * 1024,
                     max(32 * 1024 * 1024, int(vmem_needed * 1.25) + 2 * 1024 * 1024))

    if adj_resident:
        adj_spec = pl.BlockSpec((n_pad, n_pad), lambda l, i: (0, 0))   # DMA'd once, reused by all layers
    else:
        adj_spec = pl.BlockSpec((tm, n_pad), lambda l, i: (i, 0))      # streamed row tiles

    kernel = functools.partial(gcn_fused_kernel, n_nodes=float(n), tm=tm, eps=eps,
                               adj_resident=adj_resident)

    out = pl.pallas_call(
        kernel,
        out_shape=jax.ShapeDtypeStruct((n_pad, f_pad), jnp.float32),
        grid_spec=pltpu.PrefetchScalarGridSpec(
            num_scalar_prefetch=0,
            grid=(num_layers, n_tiles),
            in_specs=[
                pl.BlockSpec((n_pad, f_pad), lambda l, i: (0, 0)),        # X (bf16, resident, read at l==0)
                pl.BlockSpec((n_pad, 1), lambda l, i: (0, 0)),            # d^{-1/2} (resident)
                adj_spec,                                                 # int8 (A+I): resident or streamed
                pl.BlockSpec((1, f_pad, f_pad), lambda l, i: (l, 0, 0)),  # W_l (bf16)
                pl.BlockSpec((1, 1, f_pad), lambda l, i: (l, 0, 0)),      # gamma_l
                pl.BlockSpec((1, 1, f_pad), lambda l, i: (l, 0, 0)),      # beta_l
            ],
            out_specs=pl.BlockSpec((n_pad, f_pad), lambda l, i: (0, 0)),  # resident across grid
            scratch_shapes=[
                pltpu.VMEM((n_pad, f_pad), jnp.bfloat16),  # d^{-1/2} X W (per layer, reused by all tiles)
                pltpu.VMEM((1, f_pad), jnp.float32),       # per-feature sum
                pltpu.VMEM((1, f_pad), jnp.float32),       # per-feature sum of squares
            ],
        ),
        compiler_params=pltpu.CompilerParams(
            # Both axes carry state (resident output + BN reduction) => 'arbitrary'.
            dimension_semantics=("arbitrary", "arbitrary"),
            vmem_limit_bytes=vmem_limit,
        ),
    )(x_pad, dinv_pad, adj_pad, w_all, g_all, b_all)

    return out[:n, :f_out]


def init_gcn_params(key, num_in_feats, num_out_feats, num_layers=3):
    """Glorot-style weights; BN gamma=1, beta=0.  GCNConv bias omitted: a per-feature
    constant is exactly cancelled by the BatchNorm mean subtraction (and PyG's
    reset_parameters zero-initializes it anyway)."""
    params = []
    for l in range(num_layers):
        f_in = num_in_feats if l == 0 else num_out_feats
        key, wk = jax.random.split(key)
        scale = jnp.sqrt(6.0 / (f_in + num_out_feats))
        w = jax.random.uniform(wk, (f_in, num_out_feats), jnp.float32, -scale, scale)
        gamma = jnp.ones((num_out_feats,), jnp.float32)
        beta = jnp.zeros((num_out_feats,), jnp.float32)
        params.append((w, gamma, beta))
    return params


def gcn_reference(x, edge_index, params, eps=1e-5):
    """Pure-JAX f32 reference: GCNConv -> BatchNorm1d(train) -> ReLU, per layer."""
    n = x.shape[0]
    src, tgt = edge_index[0], edge_index[1]
    a = jnp.zeros((n, n), jnp.float32).at[tgt, src].set(1.0)
    a = jnp.maximum(a, jnp.eye(n, dtype=jnp.float32))
    deg = jnp.sum(a, axis=1)
    dis = jnp.where(deg > 0, 1.0 / jnp.sqrt(deg), 0.0)
    a_hat = dis[:, None] * a * dis[None, :]
    h = x
    for (w, gamma, beta) in params:
        h = a_hat @ (h @ w)
        mean = jnp.mean(h, axis=0, keepdims=True)
        var = jnp.mean((h - mean) ** 2, axis=0, keepdims=True)
        h = gamma[None, :] * (h - mean) / jnp.sqrt(var + eps) + beta[None, :]
        h = jnp.maximum(h, 0.0)
    return h


if __name__ == "__main__":
    key = jax.random.PRNGKey(0)

    num_nodes = 16
    num_in_feats = 8
    num_out_feats = 32
    num_layers = 3

    # deterministic node features
    key, xk = jax.random.split(key)
    x = jax.random.normal(xk, (num_nodes, num_in_feats), jnp.float32)

    # deterministic graph: bidirectional ring + a few chords (no self loops)
    idx = jnp.arange(num_nodes)
    ring_src = jnp.concatenate([idx, (idx + 1) % num_nodes])
    ring_tgt = jnp.concatenate([(idx + 1) % num_nodes, idx])
    chord_src = jnp.array([0, 5, 3, 12, 7, 2], dtype=jnp.int32)
    chord_tgt = jnp.array([5, 0, 12, 3, 2, 7], dtype=jnp.int32)
    edge_index = jnp.stack(
        [jnp.concatenate([ring_src, chord_src]).astype(jnp.int32),
         jnp.concatenate([ring_tgt, chord_tgt]).astype(jnp.int32)],
        axis=0,
    )

    params = init_gcn_params(key, num_in_feats, num_out_feats, num_layers)

    out = gcn_forward(x, edge_index, params)
    jax.block_until_ready(out)
    assert out.shape == (num_nodes, num_out_feats)

    ref = gcn_reference(x, edge_index, params)
    max_err = float(jnp.max(jnp.abs(out - ref)))
    assert max_err < 0.1, f"max abs error vs f32 reference too large: {max_err}"

    print("KERNEL_OK")
</pallas_src>

<mosaic_0001>
module attributes {stable_mosaic.version = 11 : i64} {
  func.func @gcn_fused_kernel(%arg0: i32, %arg1: i32, %arg2: memref<128x128xbf16, #tpu.memory_space<vmem>>, %arg3: memref<128x1xf32, #tpu.memory_space<vmem>>, %arg4: memref<128x128xi8, #tpu.memory_space<vmem>>, %arg5: memref<1x128x128xbf16, #tpu.memory_space<vmem>>, %arg6: memref<1x1x128xf32, #tpu.memory_space<vmem>>, %arg7: memref<1x1x128xf32, #tpu.memory_space<vmem>>, %arg8: memref<128x128xf32, #tpu.memory_space<vmem>>, %arg9: memref<128x128xbf16, #tpu.memory_space<vmem>>, %arg10: memref<1x128xf32, #tpu.memory_space<vmem>>, %arg11: memref<1x128xf32, #tpu.memory_space<vmem>>) attributes {dimension_semantics = [#tpu.dimension_semantics<arbitrary>, #tpu.dimension_semantics<arbitrary>], iteration_bounds = array<i64: 3, 1>, scalar_prefetch = 0 : i64, scratch_operands = 3 : i64, tpu.core_type = #tpu.core_type<tc>, window_params = [{pipeline_mode = #tpu.pipeline_mode<synchronous>, transform_indices = @transform_0, window_bounds = array<i64: 128, 128>}, {pipeline_mode = #tpu.pipeline_mode<synchronous>, transform_indices = @transform_1, window_bounds = array<i64: 128, 1>}, {pipeline_mode = #tpu.pipeline_mode<synchronous>, transform_indices = @transform_2, window_bounds = array<i64: 128, 128>}, {transform_indices = @transform_3, window_bounds = array<i64: 1, 128, 128>}, {transform_indices = @transform_4, window_bounds = array<i64: 1, 1, 128>}, {transform_indices = @transform_5, window_bounds = array<i64: 1, 1, 128>}, {pipeline_mode = #tpu.pipeline_mode<synchronous>, transform_indices = @transform_6, window_bounds = array<i64: 128, 128>}]} {
    %c0_i32 = arith.constant 0 : i32
    %0 = arith.cmpi eq, %arg1, %c0_i32 : i32
    %1 = arith.extui %0 : i1 to i32
    %c0_i32_0 = arith.constant 0 : i32
    %2 = arith.cmpi ne, %1, %c0_i32_0 : i32
    scf.if %2 {
      %cst_17 = arith.constant 0.000000e+00 : f32
      %30 = vector.broadcast %cst_17 : f32 to vector<1x128xf32>
      %c0_18 = arith.constant 0 : index
      %c0_19 = arith.constant 0 : index
      %31 = vector.load %arg10[%c0_18, %c0_19] : memref<1x128xf32, #tpu.memory_space<vmem>>, vector<1x128xf32>
      tpu.vector_store %arg10[%c0_18, %c0_19], %30 {strides = array<i32>} : memref<1x128xf32, #tpu.memory_space<vmem>>, vector<1x128xf32>,
      %cst_20 = arith.constant 0.000000e+00 : f32
      %32 = vector.broadcast %cst_20 : f32 to vector<1x128xf32>
      %c0_21 = arith.constant 0 : index
      %c0_22 = arith.constant 0 : index
      %33 = vector.load %arg11[%c0_21, %c0_22] : memref<1x128xf32, #tpu.memory_space<vmem>>, vector<1x128xf32>
      tpu.vector_store %arg11[%c0_21, %c0_22], %32 {strides = array<i32>} : memref<1x128xf32, #tpu.memory_space<vmem>>, vector<1x128xf32>,
      %c0_23 = arith.constant 0 : index
      %c0_24 = arith.constant 0 : index
      %c0_25 = arith.constant 0 : index
      %34 = vector.load %arg5[%c0_23, %c0_24, %c0_25] : memref<1x128x128xbf16, #tpu.memory_space<vmem>>, vector<1x128x128xbf16>
      %35 = vector.shape_cast %34 : vector<1x128x128xbf16> to vector<128x128xbf16>
      %c0_i32_26 = arith.constant 0 : i32
      %36 = arith.cmpi eq, %arg0, %c0_i32_26 : i32
      %37 = arith.extui %36 : i1 to i32
      %c0_i32_27 = arith.constant 0 : i32
      %38 = arith.cmpi ne, %37, %c0_i32_27 : i32
      scf.if %38 {
        %c0_30 = arith.constant 0 : index
        %c0_31 = arith.constant 0 : index
        %42 = vector.load %arg2[%c0_30, %c0_31] : memref<128x128xbf16, #tpu.memory_space<vmem>>, vector<128x128xbf16>
        %cst_32 = arith.constant dense<0.000000e+00> : vector<128x128xf32>
        %43 = tpu.matmul %42, %35, %cst_32 {dimension_numbers = #tpu.dot_dimension_numbers<[1], [0], [0], [1], [0, 0, 1, 1], [], []>} : vector<128x128xbf16>, vector<128x128xbf16>, vector<128x128xf32> -> vector<128x128xf32>
        %c0_33 = arith.constant 0 : index
        %c0_34 = arith.constant 0 : index
        %44 = vector.load %arg3[%c0_33, %c0_34] : memref<128x1xf32, #tpu.memory_space<vmem>>, vector<128x1xf32>
        %45 = vector.broadcast %44 : vector<128x1xf32> to vector<128x128xf32>
        %46 = arith.mulf %43, %45 : vector<128x128xf32>
        %47 = arith.truncf %46 : vector<128x128xf32> to vector<128x128xbf16>
        %c0_35 = arith.constant 0 : index
        %c0_36 = arith.constant 0 : index
        %48 = vector.load %arg9[%c0_35, %c0_36] : memref<128x128xbf16, #tpu.memory_space<vmem>>, vector<128x128xbf16>
        tpu.vector_store %arg9[%c0_35, %c0_36], %47 {strides = array<i32>} : memref<128x128xbf16, #tpu.memory_space<vmem>>, vector<128x128xbf16>,
      } else {
      }
      %c0_i32_28 = arith.constant 0 : i32
      %39 = arith.cmpi sgt, %arg0, %c0_i32_28 : i32
      %40 = arith.extui %39 : i1 to i32
      %c0_i32_29 = arith.constant 0 : i32
      %41 = arith.cmpi ne, %40, %c0_i32_29 : i32
      scf.if %41 {
        %c0_30 = arith.constant 0 : index
        %c0_31 = arith.constant 0 : index
        %42 = vector.load %arg8[%c0_30, %c0_31] : memref<128x128xf32, #tpu.memory_space<vmem>>, vector<128x128xf32>
        %43 = arith.truncf %42 : vector<128x128xf32> to vector<128x128xbf16>
        %cst_32 = arith.constant dense<0.000000e+00> : vector<128x128xf32>
        %44 = tpu.matmul %43, %35, %cst_32 {dimension_numbers = #tpu.dot_dimension_numbers<[1], [0], [0], [1], [0, 0, 1, 1], [], []>} : vector<128x128xbf16>, vector<128x128xbf16>, vector<128x128xf32> -> vector<128x128xf32>
        %c0_33 = arith.constant 0 : index
        %c0_34 = arith.constant 0 : index
        %45 = vector.load %arg3[%c0_33, %c0_34] : memref<128x1xf32, #tpu.memory_space<vmem>>, vector<128x1xf32>
        %46 = vector.broadcast %45 : vector<128x1xf32> to vector<128x128xf32>
        %47 = arith.mulf %44, %46 : vector<128x128xf32>
        %48 = arith.truncf %47 : vector<128x128xf32> to vector<128x128xbf16>
        %c0_35 = arith.constant 0 : index
        %c0_36 = arith.constant 0 : index
        %49 = vector.load %arg9[%c0_35, %c0_36] : memref<128x128xbf16, #tpu.memory_space<vmem>>, vector<128x128xbf16>
        tpu.vector_store %arg9[%c0_35, %c0_36], %48 {strides = array<i32>} : memref<128x128xbf16, #tpu.memory_space<vmem>>, vector<128x128xbf16>,
      } else {
      }
    } else {
    }
    %c128_i32 = arith.constant 128 : i32
    %3 = arith.muli %arg1, %c128_i32 : i32
    %4 = tpu.assume_multiple %3, 128 : i32
    %5 = arith.index_cast %4 : i32 to index
    %c0 = arith.constant 0 : index
    %6 = vector.load %arg4[%5, %c0] : memref<128x128xi8, #tpu.memory_space<vmem>>, vector<128x128xi8>
    %7 = arith.sitofp %6 : vector<128x128xi8> to vector<128x128xbf16>
    %c0_1 = arith.constant 0 : index
    %c0_2 = arith.constant 0 : index
    %8 = vector.load %arg9[%c0_1, %c0_2] : memref<128x128xbf16, #tpu.memory_space<vmem>>, vector<128x128xbf16>
    %cst = arith.constant dense<0.000000e+00> : vector<128x128xf32>
    %9 = tpu.matmul %7, %8, %cst {dimension_numbers = #tpu.dot_dimension_numbers<[1], [0], [0], [1], [0, 0, 1, 1], [], []>} : vector<128x128xbf16>, vector<128x128xbf16>, vector<128x128xf32> -> vector<128x128xf32>
    %10 = arith.index_cast %4 : i32 to index
    %c0_3 = arith.constant 0 : index
    %11 = vector.load %arg3[%10, %c0_3] : memref<128x1xf32, #tpu.memory_space<vmem>>, vector<128x1xf32>
    %12 = vector.broadcast %11 : vector<128x1xf32> to vector<128x128xf32>
    %13 = arith.mulf %9, %12 : vector<128x128xf32>
    %14 = arith.index_cast %4 : i32 to index
    %c0_4 = arith.constant 0 : index
    %15 = vector.load %arg8[%14, %c0_4] : memref<128x128xf32, #tpu.memory_space<vmem>>, vector<128x128xf32>
    tpu.vector_store %arg8[%14, %c0_4], %13 {strides = array<i32>} : memref<128x128xf32, #tpu.memory_space<vmem>>, vector<128x128xf32>,
    %c0_5 = arith.constant 0 : index
    %c0_6 = arith.constant 0 : index
    %16 = vector.load %arg10[%c0_5, %c0_6] : memref<1x128xf32, #tpu.memory_space<vmem>>, vector<1x128xf32>
    %cst_7 = arith.constant dense<0.000000e+00> : vector<128xf32>
    %17 = vector.multi_reduction <add>, %13, %cst_7 [0] : vector<128x128xf32> to vector<128xf32>
    %18 = vector.shape_cast %17 : vector<128xf32> to vector<1x128xf32>
    %19 = arith.addf %16, %18 : vector<1x128xf32>
    %c0_8 = arith.constant 0 : index
    %c0_9 = arith.constant 0 : index
    %20 = vector.load %arg10[%c0_8, %c0_9] : memref<1x128xf32, #tpu.memory_space<vmem>>, vector<1x128xf32>
    tpu.vector_store %arg10[%c0_8, %c0_9], %19 {strides = array<i32>} : memref<1x128xf32, #tpu.memory_space<vmem>>, vector<1x128xf32>,
    %c0_10 = arith.constant 0 : index
    %c0_11 = arith.constant 0 : index
    %21 = vector.load %arg11[%c0_10, %c0_11] : memref<1x128xf32, #tpu.memory_space<vmem>>, vector<1x128xf32>
    %22 = arith.mulf %13, %13 : vector<128x128xf32>
    %cst_12 = arith.constant dense<0.000000e+00> : vector<128xf32>
    %23 = vector.multi_reduction <add>, %22, %cst_12 [0] : vector<128x128xf32> to vector<128xf32>
    %24 = vector.shape_cast %23 : vector<128xf32> to vector<1x128xf32>
    %25 = arith.addf %21, %24 : vector<1x128xf32>
    %c0_13 = arith.constant 0 : index
    %c0_14 = arith.constant 0 : index
    %26 = vector.load %arg11[%c0_13, %c0_14] : memref<1x128xf32, #tpu.memory_space<vmem>>, vector<1x128xf32>
    tpu.vector_store %arg11[%c0_13, %c0_14], %25 {strides = array<i32>} : memref<1x128xf32, #tpu.memory_space<vmem>>, vector<1x128xf32>,
    %c0_i32_15 = arith.constant 0 : i32
    %27 = arith.cmpi eq, %arg1, %c0_i32_15 : i32
    %28 = arith.extui %27 : i1 to i32
    %c0_i32_16 = arith.constant 0 : i32
    %29 = arith.cmpi ne, %28, %c0_i32_16 : i32
    scf.if %29 {
      %c0_17 = arith.constant 0 : index
      %c0_18 = arith.constant 0 : index
      %30 = vector.load %arg10[%c0_17, %c0_18] : memref<1x128xf32, #tpu.memory_space<vmem>>, vector<1x128xf32>
      %cst_19 = arith.constant 6.250000e-02 : f32
      %31 = vector.broadcast %cst_19 : f32 to vector<1x128xf32>
      %32 = arith.mulf %30, %31 : vector<1x128xf32>
      %c0_20 = arith.constant 0 : index
      %c0_21 = arith.constant 0 : index
      %33 = vector.load %arg11[%c0_20, %c0_21] : memref<1x128xf32, #tpu.memory_space<vmem>>, vector<1x128xf32>
      %cst_22 = arith.constant 6.250000e-02 : f32
      %34 = vector.broadcast %cst_22 : f32 to vector<1x128xf32>
      %35 = arith.mulf %33, %34 : vector<1x128xf32>
      %36 = arith.mulf %32, %32 : vector<1x128xf32>
      %37 = arith.subf %35, %36 : vector<1x128xf32>
      %cst_23 = arith.constant 0.000000e+00 : f32
      %38 = vector.broadcast %cst_23 : f32 to vector<1x128xf32>
      %39 = arith.maximumf %37, %38 : vector<1x128xf32>
      %cst_24 = arith.constant 9.99999974E-6 : f32
      %40 = vector.broadcast %cst_24 : f32 to vector<1x128xf32>
      %41 = arith.addf %39, %40 : vector<1x128xf32>
      %42 = math.rsqrt %41 : vector<1x128xf32>
      %c0_25 = arith.constant 0 : index
      %c0_26 = arith.constant 0 : index
      %c0_27 = arith.constant 0 : index
      %43 = vector.load %arg6[%c0_25, %c0_26, %c0_27] : memref<1x1x128xf32, #tpu.memory_space<vmem>>, vector<1x1x128xf32>
      %44 = vector.shape_cast %43 : vector<1x1x128xf32> to vector<1x128xf32>
      %45 = arith.mulf %44, %42 : vector<1x128xf32>
      %c0_28 = arith.constant 0 : index
      %c0_29 = arith.constant 0 : index
      %c0_30 = arith.constant 0 : index
      %46 = vector.load %arg7[%c0_28, %c0_29, %c0_30] : memref<1x1x128xf32, #tpu.memory_space<vmem>>, vector<1x1x128xf32>
      %47 = vector.shape_cast %46 : vector<1x1x128xf32> to vector<1x128xf32>
      %48 = arith.mulf %32, %45 : vector<1x128xf32>
      %49 = arith.subf %47, %48 : vector<1x128xf32>
      %c0_31 = arith.constant 0 : index
      %c0_32 = arith.constant 0 : index
      %50 = vector.load %arg8[%c0_31, %c0_32] : memref<128x128xf32, #tpu.memory_space<vmem>>, vector<128x128xf32>
      %51 = vector.broadcast %45 : vector<1x128xf32> to vector<128x128xf32>
      %52 = arith.mulf %50, %51 : vector<128x128xf32>
      %53 = vector.broadcast %49 : vector<1x128xf32> to vector<128x128xf32>
      %54 = arith.addf %52, %53 : vector<128x128xf32>
      %cst_33 = arith.constant 0.000000e+00 : f32
      %55 = vector.broadcast %cst_33 : f32 to vector<128x128xf32>
      %56 = arith.maximumf %54, %55 : vector<128x128xf32>
      %c0_34 = arith.constant 0 : index
      %c0_35 = arith.constant 0 : index
      %57 = vector.load %arg8[%c0_34, %c0_35] : memref<128x128xf32, #tpu.memory_space<vmem>>, vector<128x128xf32>
      tpu.vector_store %arg8[%c0_34, %c0_35], %56 {strides = array<i32>} : memref<128x128xf32, #tpu.memory_space<vmem>>, vector<128x128xf32>,
    } else {
    }
    return
  }
  func.func @transform_0(%arg0: i32, %arg1: i32) -> (i32, i32) {
    %c0_i32 = arith.constant 0 : i32
    %c0_i32_0 = arith.constant 0 : i32
    %c0_i32_1 = arith.constant 0 : i32
    return %c0_i32, %c0_i32_0 : i32, i32
  }
  func.func @transform_1(%arg0: i32, %arg1: i32) -> (i32, i32) {
    %c0_i32 = arith.constant 0 : i32
    %c0_i32_0 = arith.constant 0 : i32
    %c0_i32_1 = arith.constant 0 : i32
    return %c0_i32, %c0_i32_0 : i32, i32
  }
  func.func @transform_2(%arg0: i32, %arg1: i32) -> (i32, i32) {
    %c0_i32 = arith.constant 0 : i32
    %c0_i32_0 = arith.constant 0 : i32
    %c0_i32_1 = arith.constant 0 : i32
    return %c0_i32, %c0_i32_0 : i32, i32
  }
  func.func @transform_3(%arg0: i32, %arg1: i32) -> (i32, i32, i32) {
    %c0_i32 = arith.constant 0 : i32
    %c0_i32_0 = arith.constant 0 : i32
    %c0_i32_1 = arith.constant 0 : i32
    return %arg0, %c0_i32, %c0_i32_0 : i32, i32, i32
  }
  func.func @transform_4(%arg0: i32, %arg1: i32) -> (i32, i32, i32) {
    %c0_i32 = arith.constant 0 : i32
    %c0_i32_0 = arith.constant 0 : i32
    %c0_i32_1 = arith.constant 0 : i32
    return %arg0, %c0_i32, %c0_i32_0 : i32, i32, i32
  }
  func.func @transform_5(%arg0: i32, %arg1: i32) -> (i32, i32, i32) {
    %c0_i32 = arith.constant 0 : i32
    %c0_i32_0 = arith.constant 0 : i32
    %c0_i32_1 = arith.constant 0 : i32
    return %arg0, %c0_i32, %c0_i32_0 : i32, i32, i32
  }
  func.func @transform_6(%arg0: i32, %arg1: i32) -> (i32, i32) {
    %c0_i32 = arith.constant 0 : i32
    %c0_i32_0 = arith.constant 0 : i32
    %c0_i32_1 = arith.constant 0 : i32
    return %c0_i32, %c0_i32_0 : i32, i32
  }
}

</mosaic_0001>

<bundles_post_ra>
// kernel: tpu_custom_call.1
= control target key start
LH: loop header
LB: loop body
LE: loop exit
PB: predicated region body
PF: predicated region fallthrough
CT: control target
= control target key end

     0   :  { %11 = vsyncpa [#allocation6], 0  ;;  %s2784_s0 = inlined_call_operand.vmem [shape: bf16[128,128], index: 0, kind: input, shape index: {}]   ;;  %s2785_s1 = inlined_call_operand.vmem [shape: f32[128,1], index: 1, kind: input, shape index: {}]   ;;  %s2786_s2 = inlined_call_operand.vmem [shape: s8[128,128], index: 2, kind: input, shape index: {}]   ;;  %s2787_s3 = inlined_call_operand.hbm [shape: bf16[3,128,128], index: 3, kind: input, shape index: {}]   ;;  %s2788_s4 = inlined_call_operand.vmem [shape: f32[3,1,128], index: 4, kind: input, shape index: {}]   ;;  %s2789_s5 = inlined_call_operand.vmem [shape: f32[3,1,128], index: 5, kind: input, shape index: {}]   ;;  %s2790_s6 = inlined_call_operand.hbm [shape: f32[128,128], index: 6, kind: output, shape index: {}]  }
   0x1   :  { %13 = vsyncpa [#allocation6 + $0x1], 0 }
   0x2   :  { %14 = vsyncpa [#allocation7], 0  ;;  %s2308_s21 = smov 0   ;;  %s2310_s22 = smov 0  }
   0x3   :  { %s2312_s23 = smov 0   ;;  %s2314_s24 = smov 0  }
   0x4   :  { %s2316_s25 = smov 0   ;;  %s2318_s26 = smov 0  }
   0x5 LB: > { %s1664_s27 = sadd.s32 4294967295, %s2261_s26   ;;  %s32_s28 = sadd.s32 1, %s2257_s25  ;;  %s2261_s26 = sphi %s2318_s26, %s20_s26   ;;  %s2257_s25 = sphi %s2316_s25, %s2799_s25   ;;  %s2253_s24 = sphi %s2314_s24, %s2798_s24   ;;  %s2249_s23 = sphi %s2312_s23, %s2797_s23   ;;  %s2245_s22 = sphi %s2310_s22, %s2796_s22   ;;  %s2241_s21 = sphi %s2308_s21, %s2795_s21  }
   0x6   : > { %p34_p0 = scmp.ge.s32.totalorder %s32_s28, 3  ;;  %s102_s29 = sadd.s32 1, %s2249_s23 }
   0x7   : > { %p109_p1 = scmp.ne.s32.totalorder %s2249_s23, %s2245_s22  ;;  %p110_p2 = scmp.eq.s32.totalorder %s2261_s26, 0 }
   0x8   : > { %s2801_s28 = smov (%p34_p0, %s32_s28), 0  ;;  %p115_p4 = scmp.ne.s32.totalorder %s2245_s22, %s2241_s21 }
   0x9   : > { %p2344_p3 = por %p110_p2, %p109_p1  ;;  %s99_s7 = ssub.s32 %s2257_s25, %s2801_s28 }
   0xa   : > { %p116_p5 = scmp.eq.s32.totalorder %s1664_s27, 0  ;;  %p100_p6 = scmp.eq.s32.totalorder %s99_s7, 0 }
   0xb   : > { %p2071_p8 = scmp.lt.s32.totalorder %s2261_s26, 3  ;;  %s221_s10 = sand.u32 1, %s2249_s23  }
   0xc   : > { %p2353_p7 = por %p116_p5, %p115_p4  ;;  %s1742_s11 = sshll.u32 %s2257_s25, 10 }
   0xd   : > { %s2359_s9 = scalar_select %p100_p6, %s2249_s23, %s102_s29  }
   0xe   : > { %s1667_s12 = sshll.u32 %s221_s10, 6  ;;  %s231_s15 = scalar_lea.hbm %s2787_s3, %s1742_s11 }
   0xf   : > { %s225_s16 = scalar_lea.vmem [#allocation5], %s1667_s12  ;;  %p2368_p9 = pnand %p2071_p8, %p2344_p3 }
  0x10   : > { %s232_s17 = sshll.u32 %s225_s16, 4  ;;  %s222_s19 = scalar_lea.sflag [#allocation6], %s221_s10  ;;  %s233_s17 = int_to_ptr.vmem [resolvable:$true] %s232_s17 }
  0x11   : > { %p2157_p10 = pneg %p2368_p9  ;;  %s2168_s20 = scalar_lea.vmem %s233_s17, 1024 }
  0x12   : > { %p2169_p11 = scmp.ne.s32.totalorder %s233_s17, %s2168_s20  ;;  %s2263_s21 = smov [#allocation5]  }
  0x13   : > { %s2173_s29 = sshll.u32 %s2263_s21, 4  ;;  %s2174_s29 = int_to_ptr.vmem [resolvable:$false] %s2173_s29 }
  0x14   : > { %p2171_p12 = pnand %p2169_p11, %p2157_p10  ;;  %s2175_s7 = scalar_lea.vmem %s2174_s29, 2048 }
  0x15   : > { %p2176_p0 = scmp.lt.s32.totalorder %s233_s17, %s2174_s29  ;;  %p2177_p1 = scmp.lt.s32.totalorder %s2175_s7, %s2168_s20 }
  0x16   : > { %p2172_p13 = pneg %p2171_p12 }
  0x17   : > { %p2178_p2 = por %p2177_p1, %p2176_p0 }
  0x19   : > { %p2179_p3 = pnand %p2178_p2, %p2172_p13 }
  0x1b   : > { %2182 = shalt.err (!%p2179_p3)
}
  0x1c   : > { %s2264_s30 = smov 64   ;;  %s2265_s10 = smov 4  }
  0x1d   : > { %2070 = dma.hbm_to_vmem [thread:$0]  (!%p2368_p9), %s231_s15, 1024, %s233_s17, %s222_s19, %s2264_s30, %s2264_s30, %s2265_s10  }
  0x1e   : > { %p1670_p4 = scmp.ge.s32.totalorder %s2261_s26, 1  ;;  %p252_p5 = scmp.lt.s32.totalorder %s2261_s26, 4 }
  0x20   : > { %p253_p6 = pnand %p1670_p4, %p252_p5 }
  0x21   : > { %s258_s11 = sand.u32 (!%p253_p6), 1, %s2245_s22  }
  0x22   : > { %256 = sbr.rel (%p253_p6) target bundleno = 892 (0x37c), region = 44  ;;  %s1671_s12 = sshll.u32 (!%p253_p6), %s258_s11, 6 }
  0x23   : > { %s259_s13 = scalar_lea.sflag (!%p253_p6), [#allocation6], %s258_s11  ;;  %s262_s14 = scalar_lea.vmem (!%p253_p6), [#allocation5], %s1671_s12 }
  0x27   : > { %2232 = dma.done.wait (%p2353_p7), %s259_s13, 1024  }
  0x28   : > { %2234 = vsyncadd (%p2353_p7), %s259_s13, 4294966272  ;;  %p292_p8 = scmp.lt.s32.totalorder %s2253_s24, 2  ;;  %v2266_v0 = vmov 0.0   ;;  %v2395_v1 = vld [vmem:[%s262_s14] sm:$0xf]  ;;  %p1672_p7 = scmp.ne.s32.totalorder %s2253_s24, 0 }
  0x29   : > { %303 = vst [vmem:[#allocation3] sm:$0x1] %v2266_v0  ;;  %304 = vst [vmem:[#allocation4] sm:$0x1] %v2266_v0  ;;  %v2397_v2 = vld [vmem:[%s262_s14 + $0x4] sm:$0xf] }
  0x2a   : > { %s2385_s15 = scalar_select %p292_p8, %s2253_s24, 2  ;;  %v2399_v3 = vld [vmem:[%s262_s14 + $0x8] sm:$0xf]  ;;  %v2401_v4 = vld [vmem:[%s262_s14 + $0xc] sm:$0xf] }
  0x2b   : > { %v2403_v5 = vld [vmem:[%s262_s14 + $0x10] sm:$0xf]  ;;  %v2405_v6 = vld [vmem:[%s262_s14 + $0x14] sm:$0xf]  ;;  %v2407_v7 = vld [vmem:[%s262_s14 + $0x18] sm:$0xf] }
  0x2c   : > { %s294_s18 = scalar_lea.vmem %s2788_s4, %s2385_s15  ;;  %s297_s21 = scalar_lea.vmem %s2789_s5, %s2385_s15  ;;  %v2409_v8 = vld [vmem:[%s262_s14 + $0x1c] sm:$0xf]  ;;  %v2411_v9 = vld [vmem:[%s262_s14 + $0x20] sm:$0xf]  ;;  %v2413_v10 = vld [vmem:[%s262_s14 + $0x24] sm:$0xf] }
  0x2d   : > { %v2415_v11 = vld [vmem:[%s262_s14 + $0x28] sm:$0xf]  ;;  %v2417_v12 = vld [vmem:[%s262_s14 + $0x2c] sm:$0xf]  ;;  %v2419_v13 = vld [vmem:[%s262_s14 + $0x30] sm:$0xf] }
  0x2e   : > { %v2421_v14 = vld [vmem:[%s262_s14 + $0x34] sm:$0xf]  ;;  %v2423_v15 = vld [vmem:[%s262_s14 + $0x38] sm:$0xf]  ;;  %v2425_v16 = vld [vmem:[%s262_s14 + $0x3c] sm:$0xf] }
  0x2f   : > { %324 = sbr.rel (%p1672_p7) target bundleno = 298 (0x12a), region = 56 }
  0x34   : > { %v1688_v17 = vcombine.low %v2423_v15, %v2425_v16  ;;  %v1687_v18 = vcombine.low %v2419_v13, %v2421_v14  ;;  %v2133_v19 = vld [vmem:[%s2784_s0] sm:$0xff]   ;;  %v1686_v21 = vcombine.low %v2415_v11, %v2417_v12  ;;  %v2267_v22 = vmov 0   ;;  %v536_v24 = vld [vmem:[%s2785_s1 + $0x10] sm:$0xff]  ;;  %v537_v26 = vld [vmem:[%s2785_s1 + $0x18] sm:$0xff] }
  0x35   : > { %v2134_v20 = vld [vmem:[%s2784_s0 + $0x20] sm:$0xff]   ;;  %1933 = vmatprep.mubr.bf16.mxu0 %v2133_v19  ;;  %2132 = vset.pattern.permute.xlu1 %v2267_v22  ;;  %v1685_v23 = vcombine.low %v2411_v9, %v2413_v10  ;;  %v535_v27 = vld [vmem:[%s2785_s1 + $0x8] sm:$0xff]  ;;  %v1684_v28 = vcombine.low %v2407_v7, %v2409_v8  ;;  %v1683_v31 = vcombine.low %v2403_v5, %v2405_v6  ;;  %v541_v32 = vld [vmem:[%s2785_s1 + $0x38] sm:$0xff] }
  0x36   : > { %1917 = vmatprep.subr.bf16.mxu0 %v1688_v17  ;;  %2013 = vmatprep.subr.bf16.mxu1 %v1688_v17  ;;  %v534_v25 = vld [vmem:[%s2785_s1] sm:$0xff]  ;;  %v539_v29 = vld [vmem:[%s2785_s1 + $0x28] sm:$0xff]  ;;  %v540_v33 = vld [vmem:[%s2785_s1 + $0x30] sm:$0xff]  ;;  %v1682_v34 = vcombine.low %v2399_v3, %v2401_v4  ;;  %v1681_v37 = vcombine.low %v2395_v1, %v2397_v2 }
  0x37   : > { %1918 = vmatpush3.bf16.msra.mxu0 %v1688_v17  ;;  %2021 = vmatpush3.bf16.msra.mxu1 %v1688_v17  ;;  %v538_v30 = vld [vmem:[%s2785_s1 + $0x20] sm:$0xff]  ;;  %v543_v35 = vld [vmem:[%s2785_s1 + $0x48] sm:$0xff]  ;;  %v545_v38 = vld [vmem:[%s2785_s1 + $0x58] sm:$0xff] }
  0x38   : > { %1919 = vmatprep.subr.bf16.mxu0 %v1687_v18  ;;  %2014 = vmatprep.subr.bf16.mxu1 %v1687_v18  ;;  %v542_v36 = vld [vmem:[%s2785_s1 + $0x40] sm:$0xff]  ;;  %v544_v39 = vld [vmem:[%s2785_s1 + $0x50] sm:$0xff]  ;;  %v2135_v40 = vld [vmem:[%s2784_s0 + $0x8] sm:$0xff]  }
  0x39   : > { %1941 = vmatprep.mubr.bf16.mxu1 %v2134_v20  ;;  %2131 = vset.pattern.permute.xlu0 %v2267_v22  ;;  %v2136_v41 = vld [vmem:[%s2784_s0 + $0x28] sm:$0xff]   ;;  %v546_v43 = vld [vmem:[%s2785_s1 + $0x60] sm:$0xff]  ;;  %v2137_v44 = vld [vmem:[%s2784_s0 + $0x10] sm:$0xff]  }
  0x3a   : > { %562 = vperm.xlu1 %2132, %v536_v24   ;;  %552 = vperm.xlu0 %2131, %v534_v25   ;;  %v547_v42 = vld [vmem:[%s2785_s1 + $0x68] sm:$0xff]  ;;  %v2138_v45 = vld [vmem:[%s2784_s0 + $0x30] sm:$0xff]   ;;  %v549_v46 = vld [vmem:[%s2785_s1 + $0x78] sm:$0xff] }
  0x3b   : > { %1920 = vmatpush3.bf16.msra.mxu0 %v1687_v18  ;;  %2022 = vmatpush3.bf16.msra.mxu1 %v1687_v18  ;;  %v548_v47 = vld [vmem:[%s2785_s1 + $0x70] sm:$0xff]  ;;  %v2139_v48 = vld [vmem:[%s2784_s0 + $0x18] sm:$0xff]  }
  0x3c   : > { %1921 = vmatprep.subr.bf16.mxu0 %v1686_v21  ;;  %2015 = vmatprep.subr.bf16.mxu1 %v1686_v21  ;;  %v2140_v49 = vld [vmem:[%s2784_s0 + $0x38] sm:$0xff]  }
  0x3e   : > { %567 = vperm.xlu1 %2132, %v537_v26   ;;  %557 = vperm.xlu0 %2131, %v535_v27  }
  0x3f   : > { %1922 = vmatpush3.bf16.msra.mxu0 %v1686_v21  ;;  %2023 = vmatpush3.bf16.msra.mxu1 %v1686_v21 }
  0x40   : > { %1923 = vmatprep.subr.bf16.mxu0 %v1685_v23  ;;  %2016 = vmatprep.subr.bf16.mxu1 %v1685_v23 }
  0x42   : > { %577 = vperm.xlu1 %2132, %v539_v29   ;;  %572 = vperm.xlu0 %2131, %v538_v30  }
  0x43   : > { %1924 = vmatpush3.bf16.msra.mxu0 %v1685_v23  ;;  %2024 = vmatpush3.bf16.msra.mxu1 %v1685_v23 }
  0x44   : > { %1925 = vmatprep.subr.bf16.mxu0 %v1684_v28  ;;  %2017 = vmatprep.subr.bf16.mxu1 %v1684_v28 }
  0x46   : > { %587 = vperm.xlu1 %2132, %v541_v32   ;;  %582 = vperm.xlu0 %2131, %v540_v33  }
  0x47   : > { %1926 = vmatpush3.bf16.msra.mxu0 %v1684_v28  ;;  %2025 = vmatpush3.bf16.msra.mxu1 %v1684_v28 }
  0x48   : > { %1927 = vmatprep.subr.bf16.mxu0 %v1683_v31  ;;  %2018 = vmatprep.subr.bf16.mxu1 %v1683_v31 }
  0x4a   : > { %597 = vperm.xlu1 %2132, %v543_v35   ;;  %592 = vperm.xlu0 %2131, %v542_v36  }
  0x4b   : > { %1928 = vmatpush3.bf16.msra.mxu0 %v1683_v31  ;;  %2026 = vmatpush3.bf16.msra.mxu1 %v1683_v31 }
  0x4c   : > { %1929 = vmatprep.subr.bf16.mxu0 %v1682_v34  ;;  %2019 = vmatprep.subr.bf16.mxu1 %v1682_v34 }
  0x4e   : > { %607 = vperm.xlu1 %2132, %v545_v38   ;;  %602 = vperm.xlu0 %2131, %v544_v39  }
  0x4f   : > { %1930 = vmatpush3.bf16.msra.mxu0 %v1682_v34  ;;  %2027 = vmatpush3.bf16.msra.mxu1 %v1682_v34 }
  0x50   : > { %1931 = vmatprep.subr.bf16.mxu0 %v1681_v37  ;;  %2020 = vmatprep.subr.bf16.mxu1 %v1681_v37 }
  0x52   : > { %617 = vperm.xlu1 %2132, %v547_v42   ;;  %612 = vperm.xlu0 %2131, %v546_v43  }
  0x53   : > { %1932 = vmatpush3.bf16.msra.mxu0 %v1681_v37  ;;  %2028 = vmatpush3.bf16.msra.mxu1 %v1681_v37 }
  0x56   : > { %1934 = vmatmul.mubr.bf16.vlgmr.msra.gmra.mxu0 %v2135_v40  ;;  %1942 = vmatmul.mubr.bf16.vlgmr.msra.gmra.mxu1 %v2136_v41 }
  0x57   : > { %1937 = vmatprep.mubr.bf16.mxu0 %v2137_v44  ;;  %1945 = vmatprep.mubr.bf16.mxu1 %v2138_v45 }
  0x58   : > { %627 = vperm.xlu1 %2132, %v549_v46   ;;  %622 = vperm.xlu0 %2131, %v548_v47  }
  0x5e   : > { %1938 = vmatmul.mubr.bf16.gmra.mxu0 %v2139_v48  ;;  %1946 = vmatmul.mubr.bf16.gmra.mxu1 %v2140_v49 }
  0xb5   : > { %v563_v50 = vpop.permute.xlu1 %562  ;;  %v553_v51 = vpop.permute.xlu0 %552 }
  0xb9   : > { %v568_v52 = vpop.permute.xlu1 %567  ;;  %v558_v53 = vpop.permute.xlu0 %557 }
  0xbd   : > { %v578_v54 = vpop.permute.xlu1 %577  ;;  %v573_v55 = vpop.permute.xlu0 %572 }
  0xc1   : > { %v588_v56 = vpop.permute.xlu1 %587  ;;  %v583_v57 = vpop.permute.xlu0 %582 }
  0xc5   : > { %v598_v58 = vpop.permute.xlu1 %597  ;;  %v593_v59 = vpop.permute.xlu0 %592 }
  0xc9   : > { %v608_v60 = vpop.permute.xlu1 %607  ;;  %v603_v61 = vpop.permute.xlu0 %602 }
  0xcd   : > { %v618_v20 = vpop.permute.xlu1 %617  ;;  %v613_v21 = vpop.permute.xlu0 %612 }
  0xd3   : > { %v628_v40 = vpop.permute.xlu1 %627  ;;  %v623_v41 = vpop.permute.xlu0 %622 }
 0x116   : > { %v1935_v62 = vpop.f32.mrf.mxu0  ;;  %v1943_v63 = vpop.f32.mrf.mxu1 }
 0x117   : > { %v632_v22 = vmul.f32 %v1935_v62, %v563_v50  ;;  %v640_v23 = vmul.f32 %v1943_v63, %v603_v61 }
 0x118   : > { %v471_v0 = vpop.f32.mrf.mxu0  ;;  %v503_v17 = vpop.f32.mrf.mxu1 }
 0x119   : > { %v630_v26 = vmul.f32 %v553_v51, %v471_v0  ;;  %v638_v27 = vmul.f32 %v593_v59, %v503_v17 }
 0x11a   : > { %v1936_v18 = vpop.f32.mrf.mxu0  ;;  %v1944_v19 = vpop.f32.mrf.mxu1 }
 0x11b   : > { %v633_v24 = vmul.f32 %v1936_v18, %v568_v52  ;;  %v641_v25 = vmul.f32 %v1944_v19, %v608_v60 }
 0x11c   : > { %v474_v28 = vpop.f32.mrf.mxu0  ;;  %v506_v29 = vpop.f32.mrf.mxu1 }
 0x11d   : > { %v1783_v30 = vpack.c.bf16 %v633_v24, %v632_v22  ;;  %v1803_v31 = vpack.c.bf16 %v641_v25, %v640_v23  ;;  %v631_v32 = vmul.f32 %v558_v53, %v474_v28  ;;  %v639_v33 = vmul.f32 %v598_v58, %v506_v29 }
 0x11e   : > { %v1939_v34 = vpop.f32.mrf.mxu0  ;;  %v1947_v35 = vpop.f32.mrf.mxu1 }
 0x11f   : > { %1855 = vst [vmem:[#allocation2 + $0x8] sm:$0xff] %v1783_v30   ;;  %1859 = vst [vmem:[#allocation2 + $0x28] sm:$0xff] %v1803_v31   ;;  %v1778_v36 = vpack.c.bf16 %v631_v32, %v630_v26  ;;  %v1798_v37 = vpack.c.bf16 %v639_v33, %v638_v27  ;;  %v636_v44 = vmul.f32 %v1939_v34, %v583_v57 }
 0x120   : > { %v487_v38 = vpop.f32.mrf.mxu0  ;;  %v519_v39 = vpop.f32.mrf.mxu1  ;;  %v644_v45 = vmul.f32 %v1947_v35, %v623_v41 }
 0x121   : > { %1779 = vst [vmem:[#allocation2] sm:$0xff] %v1778_v36   ;;  %1858 = vst [vmem:[#allocation2 + $0x20] sm:$0xff] %v1798_v37   ;;  %v634_v48 = vmul.f32 %v573_v55, %v487_v38  ;;  %v642_v49 = vmul.f32 %v613_v21, %v519_v39 }
 0x122   : > { %v1940_v42 = vpop.f32.mrf.mxu0  ;;  %v1948_v43 = vpop.f32.mrf.mxu1 }
 0x123   : > { %v637_v46 = vmul.f32 %v1940_v42, %v588_v56  ;;  %v645_v47 = vmul.f32 %v1948_v43, %v628_v40 }
 0x124   : > { %v490_v50 = vpop.f32.mrf.mxu0  ;;  %v522_v51 = vpop.f32.mrf.mxu1 }
 0x125   : > { %v1793_v52 = vpack.c.bf16 %v637_v46, %v636_v44  ;;  %v1813_v53 = vpack.c.bf16 %v645_v47, %v644_v45  ;;  %v635_v58 = vmul.f32 %v578_v54, %v490_v50  ;;  %v643_v59 = vmul.f32 %v618_v20, %v522_v51 }
 0x127   : > { %1857 = vst [vmem:[#allocation2 + $0x18] sm:$0xff] %v1793_v52   ;;  %1861 = vst [vmem:[#allocation2 + $0x38] sm:$0xff] %v1813_v53   ;;  %v1788_v60 = vpack.c.bf16 %v635_v58, %v634_v48  ;;  %v1808_v61 = vpack.c.bf16 %v643_v59, %v642_v49 }
 0x129   : > { %1856 = vst [vmem:[#allocation2 + $0x10] sm:$0xff] %v1788_v60   ;;  %1860 = vst [vmem:[#allocation2 + $0x30] sm:$0xff] %v1808_v61  }
 0x12a PF: > { %p1705_p9 = scmp.le.s32.totalorder %s2253_s24, 0 }
 0x12c   : > { %729 = sbr.rel (%p1705_p9) target bundleno = 551 (0x227), region = 60 }
 0x131   : > { %v1713_v55 = vcombine.low %v2423_v15, %v2425_v16  ;;  %v1712_v56 = vcombine.low %v2419_v13, %v2421_v14  ;;  %v730_v57 = vld [vmem:[#allocation8] sm:$0xff]  ;;  %v731_v62 = vld [vmem:[#allocation8 + $0x8] sm:$0xff]  ;;  %v1711_v18 = vcombine.low %v2415_v11, %v2417_v12  ;;  %v2268_v15 = vmov 0   ;;  %v902_v12 = vld [vmem:[%s2785_s1 + $0x18] sm:$0xff] }
 0x132   : > { %v738_v54 = vld [vmem:[#allocation8 + $0x40] sm:$0xff]  ;;  %v739_v63 = vld [vmem:[#allocation8 + $0x48] sm:$0xff]  ;;  %v746_v0 = vpack.c.bf16 %v731_v62, %v730_v57  ;;  %2142 = vset.pattern.permute.xlu1 %v2268_v15  ;;  %2141 = vset.pattern.permute.xlu0 %v2268_v15  ;;  %v1710_v11 = vcombine.low %v2411_v9, %v2413_v10  ;;  %v1709_v19 = vcombine.low %v2407_v7, %v2409_v8  ;;  %v906_v7 = vld [vmem:[%s2785_s1 + $0x38] sm:$0xff] }
 0x133   : > { %1949 = vmatprep.subr.bf16.mxu0 %v1713_v55  ;;  %2029 = vmatprep.subr.bf16.mxu1 %v1713_v55  ;;  %v750_v17 = vpack.c.bf16 %v739_v63, %v738_v54  ;;  %v901_v13 = vld [vmem:[%s2785_s1 + $0x10] sm:$0xff]  ;;  %v899_v14 = vld [vmem:[%s2785_s1] sm:$0xff]  ;;  %v900_v16 = vld [vmem:[%s2785_s1 + $0x8] sm:$0xff]  ;;  %v1708_v20 = vcombine.low %v2403_v5, %v2405_v6  ;;  %v1707_v21 = vcombine.low %v2399_v3, %v2401_v4 }
 0x134   : > { %1950 = vmatpush3.bf16.msra.mxu0 %v1713_v55  ;;  %2037 = vmatpush3.bf16.msra.mxu1 %v1713_v55  ;;  %v904_v9 = vld [vmem:[%s2785_s1 + $0x28] sm:$0xff]  ;;  %v903_v10 = vld [vmem:[%s2785_s1 + $0x20] sm:$0xff]  ;;  %v905_v8 = vld [vmem:[%s2785_s1 + $0x30] sm:$0xff]  ;;  %v1706_v22 = vcombine.low %v2395_v1, %v2397_v2 }
 0x135   : > { %1951 = vmatprep.subr.bf16.mxu0 %v1712_v56  ;;  %2030 = vmatprep.subr.bf16.mxu1 %v1712_v56  ;;  %v908_v5 = vld [vmem:[%s2785_s1 + $0x48] sm:$0xff]  ;;  %v907_v6 = vld [vmem:[%s2785_s1 + $0x40] sm:$0xff]  ;;  %v732_v23 = vld [vmem:[#allocation8 + $0x10] sm:$0xff] }
 0x136   : > { %1965 = vmatprep.mubr.bf16.mxu0 %v746_v0  ;;  %1973 = vmatprep.mubr.bf16.mxu1 %v750_v17  ;;  %v733_v3 = vld [vmem:[#allocation8 + $0x18] sm:$0xff]  ;;  %v909_v24 = vld [vmem:[%s2785_s1 + $0x50] sm:$0xff]  ;;  %v734_v27 = vld [vmem:[#allocation8 + $0x20] sm:$0xff] }
 0x137   : > { %927 = vperm.xlu1 %2142, %v901_v13   ;;  %917 = vperm.xlu0 %2141, %v899_v14   ;;  %v910_v4 = vld [vmem:[%s2785_s1 + $0x58] sm:$0xff]  ;;  %v735_v1 = vld [vmem:[#allocation8 + $0x28] sm:$0xff]  ;;  %v742_v2 = vld [vmem:[#allocation8 + $0x60] sm:$0xff]  ;;  %v747_v29 = vpack.c.bf16 %v733_v3, %v732_v23 }
 0x138   : > { %1952 = vmatpush3.bf16.msra.mxu0 %v1712_v56  ;;  %2038 = vmatpush3.bf16.msra.mxu1 %v1712_v56  ;;  %v740_v25 = vld [vmem:[#allocation8 + $0x50] sm:$0xff]  ;;  %v741_v26 = vld [vmem:[#allocation8 + $0x58] sm:$0xff]  ;;  %v743_v28 = vld [vmem:[#allocation8 + $0x68] sm:$0xff]  ;;  %v748_v33 = vpack.c.bf16 %v735_v1, %v734_v27 }
 0x139   : > { %1953 = vmatprep.subr.bf16.mxu0 %v1711_v18  ;;  %2031 = vmatprep.subr.bf16.mxu1 %v1711_v18  ;;  %v751_v30 = vpack.c.bf16 %v741_v26, %v740_v25  ;;  %v912_v31 = vld [vmem:[%s2785_s1 + $0x68] sm:$0xff]  ;;  %v911_v32 = vld [vmem:[%s2785_s1 + $0x60] sm:$0xff]  ;;  %v752_v34 = vpack.c.bf16 %v743_v28, %v742_v2  ;;  %v736_v35 = vld [vmem:[#allocation8 + $0x30] sm:$0xff] }
 0x13a   : > { %v914_v36 = vld [vmem:[%s2785_s1 + $0x78] sm:$0xff]  ;;  %v913_v37 = vld [vmem:[%s2785_s1 + $0x70] sm:$0xff] }
 0x13b   : > { %932 = vperm.xlu1 %2142, %v902_v12   ;;  %922 = vperm.xlu0 %2141, %v900_v16   ;;  %v737_v38 = vld [vmem:[#allocation8 + $0x38] sm:$0xff]  ;;  %v744_v39 = vld [vmem:[#allocation8 + $0x70] sm:$0xff] }
 0x13c   : > { %1954 = vmatpush3.bf16.msra.mxu0 %v1711_v18  ;;  %2039 = vmatpush3.bf16.msra.mxu1 %v1711_v18  ;;  %v745_v40 = vld [vmem:[#allocation8 + $0x78] sm:$0xff]  ;;  %v749_v41 = vpack.c.bf16 %v737_v38, %v736_v35 }
 0x13d   : > { %1955 = vmatprep.subr.bf16.mxu0 %v1710_v11  ;;  %2032 = vmatprep.subr.bf16.mxu1 %v1710_v11  ;;  %v753_v42 = vpack.c.bf16 %v745_v40, %v744_v39 }
 0x13f   : > { %942 = vperm.xlu1 %2142, %v904_v9   ;;  %937 = vperm.xlu0 %2141, %v903_v10  }
 0x140   : > { %1956 = vmatpush3.bf16.msra.mxu0 %v1710_v11  ;;  %2040 = vmatpush3.bf16.msra.mxu1 %v1710_v11 }
 0x141   : > { %1957 = vmatprep.subr.bf16.mxu0 %v1709_v19  ;;  %2033 = vmatprep.subr.bf16.mxu1 %v1709_v19 }
 0x143   : > { %952 = vperm.xlu1 %2142, %v906_v7   ;;  %947 = vperm.xlu0 %2141, %v905_v8  }
 0x144   : > { %1958 = vmatpush3.bf16.msra.mxu0 %v1709_v19  ;;  %2041 = vmatpush3.bf16.msra.mxu1 %v1709_v19 }
 0x145   : > { %1959 = vmatprep.subr.bf16.mxu0 %v1708_v20  ;;  %2034 = vmatprep.subr.bf16.mxu1 %v1708_v20 }
 0x147   : > { %962 = vperm.xlu1 %2142, %v908_v5   ;;  %957 = vperm.xlu0 %2141, %v907_v6  }
 0x148   : > { %1960 = vmatpush3.bf16.msra.mxu0 %v1708_v20  ;;  %2042 = vmatpush3.bf16.msra.mxu1 %v1708_v20 }
 0x149   : > { %1961 = vmatprep.subr.bf16.mxu0 %v1707_v21  ;;  %2035 = vmatprep.subr.bf16.mxu1 %v1707_v21 }
 0x14b   : > { %972 = vperm.xlu1 %2142, %v910_v4   ;;  %967 = vperm.xlu0 %2141, %v909_v24  }
 0x14c   : > { %1962 = vmatpush3.bf16.msra.mxu0 %v1707_v21  ;;  %2043 = vmatpush3.bf16.msra.mxu1 %v1707_v21 }
 0x14d   : > { %1963 = vmatprep.subr.bf16.mxu0 %v1706_v22  ;;  %2036 = vmatprep.subr.bf16.mxu1 %v1706_v22 }
 0x14f   : > { %982 = vperm.xlu1 %2142, %v912_v31   ;;  %977 = vperm.xlu0 %2141, %v911_v32  }
 0x150   : > { %1964 = vmatpush3.bf16.msra.mxu0 %v1706_v22  ;;  %2044 = vmatpush3.bf16.msra.mxu1 %v1706_v22 }
 0x153   : > { %1966 = vmatmul.mubr.bf16.vlgmr.msra.gmra.mxu0 %v747_v29  ;;  %1974 = vmatmul.mubr.bf16.vlgmr.msra.gmra.mxu1 %v751_v30 }
 0x154   : > { %1969 = vmatprep.mubr.bf16.mxu0 %v748_v33  ;;  %1977 = vmatprep.mubr.bf16.mxu1 %v752_v34 }
 0x155   : > { %992 = vperm.xlu1 %2142, %v914_v36   ;;  %987 = vperm.xlu0 %2141, %v913_v37  }
 0x15b   : > { %1970 = vmatmul.mubr.bf16.gmra.mxu0 %v749_v41  ;;  %1978 = vmatmul.mubr.bf16.gmra.mxu1 %v753_v42 }
 0x1b2   : > { %v928_v43 = vpop.permute.xlu1 %927  ;;  %v918_v44 = vpop.permute.xlu0 %917 }
 0x1b6   : > { %v933_v45 = vpop.permute.xlu1 %932  ;;  %v923_v46 = vpop.permute.xlu0 %922 }
 0x1ba   : > { %v943_v47 = vpop.permute.xlu1 %942  ;;  %v938_v48 = vpop.permute.xlu0 %937 }
 0x1be   : > { %v953_v49 = vpop.permute.xlu1 %952  ;;  %v948_v50 = vpop.permute.xlu0 %947 }
 0x1c2   : > { %v963_v51 = vpop.permute.xlu1 %962  ;;  %v958_v52 = vpop.permute.xlu0 %957 }
 0x1c6   : > { %v973_v53 = vpop.permute.xlu1 %972  ;;  %v968_v58 = vpop.permute.xlu0 %967 }
 0x1ca   : > { %v983_v62 = vpop.permute.xlu1 %982  ;;  %v978_v54 = vpop.permute.xlu0 %977 }
 0x1d0   : > { %v993_v6 = vpop.permute.xlu1 %992  ;;  %v988_v22 = vpop.permute.xlu0 %987 }
 0x213   : > { %v1967_v59 = vpop.f32.mrf.mxu0  ;;  %v1975_v60 = vpop.f32.mrf.mxu1 }
 0x214   : > { %v997_v63 = vmul.f32 %v1967_v59, %v928_v43  ;;  %v1005_v0 = vmul.f32 %v1975_v60, %v968_v58 }
 0x215   : > { %v836_v61 = vpop.f32.mrf.mxu0  ;;  %v868_v55 = vpop.f32.mrf.mxu1 }
 0x216   : > { %v995_v15 = vmul.f32 %v918_v44, %v836_v61  ;;  %v1003_v13 = vmul.f32 %v958_v52, %v868_v55 }
 0x217   : > { %v1968_v56 = vpop.f32.mrf.mxu0  ;;  %v1976_v57 = vpop.f32.mrf.mxu1 }
 0x218   : > { %v998_v17 = vmul.f32 %v1968_v56, %v933_v45  ;;  %v1006_v18 = vmul.f32 %v1976_v57, %v973_v53 }
 0x219   : > { %v839_v14 = vpop.f32.mrf.mxu0  ;;  %v871_v11 = vpop.f32.mrf.mxu1 }
 0x21a   : > { %v1823_v12 = vpack.c.bf16 %v998_v17, %v997_v63  ;;  %v1843_v16 = vpack.c.bf16 %v1006_v18, %v1005_v0  ;;  %v996_v19 = vmul.f32 %v923_v46, %v839_v14  ;;  %v1004_v9 = vmul.f32 %v963_v51, %v871_v11 }
 0x21b   : > { %v1971_v10 = vpop.f32.mrf.mxu0  ;;  %v1979_v20 = vpop.f32.mrf.mxu1 }
 0x21c   : > { %1862 = vst [vmem:[#allocation2 + $0x8] sm:$0xff] %v1823_v12   ;;  %1866 = vst [vmem:[#allocation2 + $0x28] sm:$0xff] %v1843_v16   ;;  %v1818_v7 = vpack.c.bf16 %v996_v19, %v995_v15  ;;  %v1838_v8 = vpack.c.bf16 %v1004_v9, %v1003_v13  ;;  %v1001_v4 = vmul.f32 %v1971_v10, %v948_v50 }
 0x21d   : > { %v852_v21 = vpop.f32.mrf.mxu0  ;;  %v884_v5 = vpop.f32.mrf.mxu1  ;;  %v1009_v24 = vmul.f32 %v1979_v20, %v988_v22 }
 0x21e   : > { %1819 = vst [vmem:[#allocation2] sm:$0xff] %v1818_v7   ;;  %1865 = vst [vmem:[#allocation2 + $0x20] sm:$0xff] %v1838_v8   ;;  %v999_v27 = vmul.f32 %v938_v48, %v852_v21  ;;  %v1007_v1 = vmul.f32 %v978_v54, %v884_v5 }
 0x21f   : > { %v1972_v23 = vpop.f32.mrf.mxu0  ;;  %v1980_v3 = vpop.f32.mrf.mxu1 }
 0x220   : > { %v1002_v25 = vmul.f32 %v1972_v23, %v953_v49  ;;  %v1010_v26 = vmul.f32 %v1980_v3, %v993_v6 }
 0x221   : > { %v855_v2 = vpop.f32.mrf.mxu0  ;;  %v887_v28 = vpop.f32.mrf.mxu1 }
 0x222   : > { %v1833_v29 = vpack.c.bf16 %v1002_v25, %v1001_v4  ;;  %v1853_v30 = vpack.c.bf16 %v1010_v26, %v1009_v24  ;;  %v1000_v31 = vmul.f32 %v943_v47, %v855_v2  ;;  %v1008_v32 = vmul.f32 %v983_v62, %v887_v28 }
 0x224   : > { %1864 = vst [vmem:[#allocation2 + $0x18] sm:$0xff] %v1833_v29   ;;  %1868 = vst [vmem:[#allocation2 + $0x38] sm:$0xff] %v1853_v30   ;;  %v1828_v33 = vpack.c.bf16 %v1000_v31, %v999_v27  ;;  %v1848_v34 = vpack.c.bf16 %v1008_v32, %v1007_v1 }
 0x226   : > { %1863 = vst [vmem:[#allocation2 + $0x10] sm:$0xff] %v1828_v33   ;;  %1867 = vst [vmem:[#allocation2 + $0x30] sm:$0xff] %v1848_v34  }
 0x227 PF: > { %v2269_v37 = vmov 0   ;;  %v2147_v38 = vld [vmem:[#allocation2 + $0x28] sm:$0xff]   ;;  %v2148_v39 = vld [vmem:[#allocation2 + $0x20] sm:$0xff]   ;;  %v2589_v41 = vld [vmem:[%s2786_s2 + $0x10] sm:$0xff]  ;;  %s2270_s15 = smov [#allocation8]   ;;  %p2751_p10 = scmp.eq.s32.totalorder %s1664_s27, 2 }
 0x228   : > { %2143 = vset.pattern.permute.xlu0 %v2269_v37  ;;  %2144 = vset.pattern.permute.xlu1 %v2269_v37  ;;  %v2584_v40 = vld [vmem:[%s2786_s2] sm:$0xff]  ;;  %v1104_v43 = vunpack.c.l.s8.bf16 %v2589_v41  ;;  %v1272_v45 = vld [vmem:[%s2785_s1 + $0x10] sm:$0xff]  ;;  %v1271_v46 = vld [vmem:[%s2785_s1 + $0x8] sm:$0xff]  ;;  %v1105_v63 = vunpack.c.h.s8.bf16 %v2589_v41 }
 0x229   : > { %v1100_v42 = vunpack.c.l.s8.bf16 %v2584_v40  ;;  %v1270_v44 = vld [vmem:[%s2785_s1] sm:$0xff]  ;;  %1298 = vperm.xlu1 %2144, %v1272_v45   ;;  %v1273_v47 = vld [vmem:[%s2785_s1 + $0x18] sm:$0xff]  ;;  %v1275_v50 = vld [vmem:[%s2785_s1 + $0x28] sm:$0xff]  ;;  %v1101_v54 = vunpack.c.h.s8.bf16 %v2584_v40 }
 0x22a   : > { %1288 = vperm.xlu0 %2143, %v1270_v44   ;;  %2005 = vmatprep.mubr.bf16.mxu1 %v1104_v43  ;;  %v1274_v49 = vld [vmem:[%s2785_s1 + $0x20] sm:$0xff]  ;;  %v1276_v52 = vld [vmem:[%s2785_s1 + $0x30] sm:$0xff]  ;;  %v1277_v53 = vld [vmem:[%s2785_s1 + $0x38] sm:$0xff] }
 0x22b   : > { %v2145_v35 = vld [vmem:[#allocation2 + $0x38] sm:$0xff]   ;;  %1997 = vmatprep.mubr.bf16.mxu0 %v1100_v42  ;;  %v2151_v58 = vld [vmem:[#allocation2 + $0x8] sm:$0xff]   ;;  %v1278_v59 = vld [vmem:[%s2785_s1 + $0x40] sm:$0xff] }
 0x22c   : > { %1981 = vmatprep.subr.bf16.mxu0 %v2145_v35  ;;  %2045 = vmatprep.subr.bf16.mxu1 %v2145_v35  ;;  %v2149_v48 = vld [vmem:[#allocation2 + $0x18] sm:$0xff]   ;;  %v1279_v60 = vld [vmem:[%s2785_s1 + $0x48] sm:$0xff]  ;;  %v2152_v61 = vld [vmem:[#allocation2] sm:$0xff]  }
 0x22d   : > { %v2146_v36 = vld [vmem:[#allocation2 + $0x30] sm:$0xff]   ;;  %1982 = vmatpush3.bf16.msra.mxu0 %v2145_v35  ;;  %2053 = vmatpush3.bf16.msra.mxu1 %v2145_v35  ;;  %v1281_v56 = vld [vmem:[%s2785_s1 + $0x58] sm:$0xff]  ;;  %v1097_v57 = vld [vmem:[%s2786_s2 + $0x8] sm:$0xff] }
 0x22e   : > { %1983 = vmatprep.subr.bf16.mxu0 %v2146_v36  ;;  %2046 = vmatprep.subr.bf16.mxu1 %v2146_v36  ;;  %v2150_v51 = vld [vmem:[#allocation2 + $0x10] sm:$0xff]   ;;  %v1099_v62 = vld [vmem:[%s2786_s2 + $0x18] sm:$0xff]  ;;  %v1102_v0 = vunpack.c.l.s8.bf16 %v1097_v57  ;;  %v1282_v18 = vld [vmem:[%s2785_s1 + $0x60] sm:$0xff]  ;;  %v1103_v11 = vunpack.c.h.s8.bf16 %v1097_v57 }
 0x22f   : > { %1293 = vperm.xlu0 %2143, %v1271_v46   ;;  %1303 = vperm.xlu1 %2144, %v1273_v47   ;;  %v1280_v55 = vld [vmem:[%s2785_s1 + $0x50] sm:$0xff]  ;;  %v1106_v17 = vunpack.c.l.s8.bf16 %v1099_v62  ;;  %v1283_v15 = vld [vmem:[%s2785_s1 + $0x68] sm:$0xff]  ;;  %v1285_v14 = vld [vmem:[%s2785_s1 + $0x78] sm:$0xff]  ;;  %v1107_v12 = vunpack.c.h.s8.bf16 %v1099_v62 }
 0x230   : > { %v1284_v13 = vld [vmem:[%s2785_s1 + $0x70] sm:$0xff] }
 0x231   : > { %1984 = vmatpush3.bf16.msra.mxu0 %v2146_v36  ;;  %2054 = vmatpush3.bf16.msra.mxu1 %v2146_v36 }
 0x232   : > { %1985 = vmatprep.subr.bf16.mxu0 %v2147_v38  ;;  %2047 = vmatprep.subr.bf16.mxu1 %v2147_v38 }
 0x233   : > { %1308 = vperm.xlu0 %2143, %v1274_v49   ;;  %1313 = vperm.xlu1 %2144, %v1275_v50  }
 0x235   : > { %1986 = vmatpush3.bf16.msra.mxu0 %v2147_v38  ;;  %2055 = vmatpush3.bf16.msra.mxu1 %v2147_v38 }
 0x236   : > { %1987 = vmatprep.subr.bf16.mxu0 %v2148_v39  ;;  %2048 = vmatprep.subr.bf16.mxu1 %v2148_v39 }
 0x237   : > { %1318 = vperm.xlu0 %2143, %v1276_v52   ;;  %1323 = vperm.xlu1 %2144, %v1277_v53  }
 0x239   : > { %1988 = vmatpush3.bf16.msra.mxu0 %v2148_v39  ;;  %2056 = vmatpush3.bf16.msra.mxu1 %v2148_v39 }
 0x23a   : > { %1989 = vmatprep.subr.bf16.mxu0 %v2149_v48  ;;  %2049 = vmatprep.subr.bf16.mxu1 %v2149_v48 }
 0x23b   : > { %1328 = vperm.xlu0 %2143, %v1278_v59   ;;  %1333 = vperm.xlu1 %2144, %v1279_v60  }
 0x23d   : > { %1990 = vmatpush3.bf16.msra.mxu0 %v2149_v48  ;;  %2057 = vmatpush3.bf16.msra.mxu1 %v2149_v48 }
 0x23e   : > { %1991 = vmatprep.subr.bf16.mxu0 %v2150_v51  ;;  %2050 = vmatprep.subr.bf16.mxu1 %v2150_v51 }
 0x23f   : > { %1338 = vperm.xlu0 %2143, %v1280_v55   ;;  %1343 = vperm.xlu1 %2144, %v1281_v56  }
 0x241   : > { %1992 = vmatpush3.bf16.msra.mxu0 %v2150_v51  ;;  %2058 = vmatpush3.bf16.msra.mxu1 %v2150_v51 }
 0x242   : > { %1993 = vmatprep.subr.bf16.mxu0 %v2151_v58  ;;  %2051 = vmatprep.subr.bf16.mxu1 %v2151_v58 }
 0x243   : > { %1348 = vperm.xlu0 %2143, %v1282_v18   ;;  %1353 = vperm.xlu1 %2144, %v1283_v15  }
 0x245   : > { %1994 = vmatpush3.bf16.msra.mxu0 %v2151_v58  ;;  %2059 = vmatpush3.bf16.msra.mxu1 %v2151_v58 }
 0x246   : > { %1995 = vmatprep.subr.bf16.mxu0 %v2152_v61  ;;  %2052 = vmatprep.subr.bf16.mxu1 %v2152_v61 }
 0x247   : > { %1358 = vperm.xlu0 %2143, %v1284_v13   ;;  %1363 = vperm.xlu1 %2144, %v1285_v14  }
 0x249   : > { %1996 = vmatpush3.bf16.msra.mxu0 %v2152_v61  ;;  %2060 = vmatpush3.bf16.msra.mxu1 %v2152_v61 }
 0x24c   : > { %1998 = vmatmul.mubr.bf16.vlgmr.msra.gmra.mxu0 %v1101_v54  ;;  %2006 = vmatmul.mubr.bf16.vlgmr.msra.gmra.mxu1 %v1105_v63 }
 0x24d   : > { %2001 = vmatprep.mubr.bf16.mxu0 %v1102_v0  ;;  %2009 = vmatprep.mubr.bf16.mxu1 %v1106_v17 }
 0x254   : > { %2002 = vmatmul.mubr.bf16.gmra.mxu0 %v1103_v11  ;;  %2010 = vmatmul.mubr.bf16.gmra.mxu1 %v1107_v12 }
 0x2a4   : > { %v1299_v19 = vpop.permute.xlu1 %1298 }
 0x2a5   : > { %v1289_v16 = vpop.permute.xlu0 %1288 }
 0x2aa   : > { %v1294_v9 = vpop.permute.xlu0 %1293  ;;  %v1304_v10 = vpop.permute.xlu1 %1303 }
 0x2ae   : > { %v1309_v20 = vpop.permute.xlu0 %1308  ;;  %v1314_v21 = vpop.permute.xlu1 %1313 }
 0x2b2   : > { %v1319_v23 = vpop.permute.xlu0 %1318  ;;  %v1324_v25 = vpop.permute.xlu1 %1323 }
 0x2b6   : > { %v1329_v37 = vpop.permute.xlu0 %1328  ;;  %v1334_v39 = vpop.permute.xlu1 %1333 }
 0x2ba   : > { %v1339_v58 = vpop.permute.xlu0 %1338  ;;  %v1344_v57 = vpop.permute.xlu1 %1343 }
 0x2be   : > { %v1349_v11 = vpop.permute.xlu0 %1348 }
 0x30c   : > { %v1999_v7 = vpop.f32.mrf.mxu0  ;;  %v2007_v8 = vpop.f32.mrf.mxu1 }
 0x30d   : > { %v2651_v26 = vmul.f32 %v1999_v7, %v1299_v19  ;;  %v2693_v18 = vmul.f32 %v2007_v8, %v1339_v58 }
 0x30e   : > { %v1206_v5 = vpop.f32.mrf.mxu0  ;;  %v1238_v6 = vpop.f32.mrf.mxu1 }
 0x30f   : > { %v2649_v3 = vmul.f32 %v1289_v16, %v1206_v5  ;;  %v1426_v33 = vmul.f32 %v2651_v26, %v2651_v26  ;;  %v2683_v60 = vmul.f32 %v1329_v37, %v1238_v6  ;;  %v1434_v7 = vmul.f32 %v2693_v18, %v2693_v18 }
 0x310   : > { %v2000_v22 = vpop.f32.mrf.mxu0  ;;  %v2008_v4 = vpop.f32.mrf.mxu1 }
 0x311   : > { %v1424_v2 = vmul.f32 %v2649_v3, %v2649_v3  ;;  %v2657_v28 = vmul.f32 %v2000_v22, %v1304_v10  ;;  %v1432_v15 = vmul.f32 %v2683_v60, %v2683_v60  ;;  %v2698_v12 = vmul.f32 %v2008_v4, %v1344_v57  ;;  %v1354_v10 = vpop.permute.xlu1 %1353 }
 0x312   : > { %v1209_v24 = vpop.f32.mrf.mxu0  ;;  %v1241_v31 = vpop.f32.mrf.mxu1 }
 0x313   : > { %v2653_v27 = vmul.f32 %v1294_v9, %v1209_v24  ;;  %v1427_v40 = vmul.f32 %v2657_v28, %v2657_v28  ;;  %v2688_v62 = vmul.f32 %v1334_v39, %v1241_v31  ;;  %v1435_v6 = vmul.f32 %v2698_v12, %v2698_v12  ;;  %v1359_v24 = vpop.permute.xlu0 %1358 }
 0x314   : > { %v2003_v1 = vpop.f32.mrf.mxu0  ;;  %v2011_v44 = vpop.f32.mrf.mxu1 }
 0x315   : > { %v1400_v29 = vadd.f32 %v2653_v27, %v2649_v3  ;;  %v1425_v30 = vmul.f32 %v2653_v27, %v2653_v27  ;;  %v2671_v43 = vmul.f32 %v2003_v1, %v1319_v23  ;;  %v1433_v16 = vmul.f32 %v2688_v62, %v2688_v62 }
 0x316   : > { %v1222_v32 = vpop.f32.mrf.mxu0  ;;  %v1254_v59 = vpop.f32.mrf.mxu1 }
 0x317   : > { %v1401_v34 = vadd.f32 %v1400_v29, %v2651_v26  ;;  %v1440_v35 = vadd.f32 %v1425_v30, %v1424_v2  ;;  %v2666_v36 = vmul.f32 %v1309_v20, %v1222_v32  ;;  %v1430_v61 = vmul.f32 %v2671_v43, %v2671_v43  ;;  %v1364_v30 = vpop.permute.xlu1 %1363 }
 0x318   : > { %v2004_v38 = vpop.f32.mrf.mxu0  ;;  %v2012_v17 = vpop.f32.mrf.mxu1  ;;  %v2705_v8 = vmul.f32 %v1349_v11, %v1254_v59  ;;  %v1399_v59 = vld [vmem:[#allocation3] sm:$0x1] }
 0x319   : > { %v1441_v41 = vadd.f32 %v1440_v35, %v1426_v33  ;;  %v1402_v42 = vadd.f32 %v1401_v34, %v2657_v28  ;;  %v1428_v47 = vmul.f32 %v2666_v36, %v2666_v36  ;;  %v2678_v51 = vmul.f32 %v2004_v38, %v1324_v25 }
 0x31a   : > { %v1225_v45 = vpop.f32.mrf.mxu0  ;;  %v1257_v20 = vpop.f32.mrf.mxu1  ;;  %v2711_v25 = vmul.f32 %v2011_v44, %v1359_v24  ;;  %v1436_v1 = vmul.f32 %v2705_v8, %v2705_v8  ;;  %v2716_v31 = vmul.f32 %v2012_v17, %v1364_v30 }
 0x31b   : > { %v1403_v46 = vadd.f32 %v1402_v42, %v2666_v36  ;;  %v1442_v48 = vadd.f32 %v1441_v41, %v1427_v40  ;;  %v2676_v49 = vmul.f32 %v1314_v21, %v1225_v45  ;;  %v1431_v54 = vmul.f32 %v2678_v51, %v2678_v51 }
 0x31c   : > { %v1379_v22 = vmul.f32 %v1354_v10, %v1257_v20  ;;  %v1438_v35 = vmul.f32 %v2711_v25, %v2711_v25  ;;  %v1439_v39 = vmul.f32 %v2716_v31, %v2716_v31  ;;  %v1475_v20 = vld [vmem:[%s294_s18] sm:$0x1]  ;;  %s1578_s18 = sshll.u32 %s2270_s15, 4  ;;  %s1579_s18 = int_to_ptr.vmem [resolvable:$true] %s1578_s18 }
 0x31d   : > { %v1443_v50 = vadd.f32 %v1442_v48, %v1428_v47  ;;  %v1404_v52 = vadd.f32 %v1403_v46, %v2676_v49  ;;  %v1429_v53 = vmul.f32 %v2676_v49, %v2676_v49  ;;  %s2183_s29 = scalar_lea.vmem %s1579_s18, 2048  ;;  %p2190_p0 = scmp.lt.s32.totalorder %s1579_s18, %s1579_s18 }
 0x31e   : > { %v1437_v33 = vmul.f32 %v1379_v22, %v1379_v22  ;;  %p2184_p11 = scmp.ne.s32.totalorder %s1579_s18, %s2183_s29  ;;  %p2191_p1 = scmp.lt.s32.totalorder %s2183_s29, %s2183_s29 }
 0x31f   : > { %v1405_v55 = vadd.f32 %v1404_v52, %v2671_v43  ;;  %v1444_v56 = vadd.f32 %v1443_v50, %v1429_v53 }
 0x320   : > { %p2185_p12 = pnand %p2184_p11, %p2751_p10  ;;  %p2192_p2 = por %p2191_p1, %p2190_p0 }
 0x321   : > { %v1406_v63 = vadd.f32 %v1405_v55, %v2678_v51  ;;  %v1445_v0 = vadd.f32 %v1444_v56, %v1430_v61  ;;  %v1423_v56 = vld [vmem:[#allocation4] sm:$0x1] }
 0x322   : > { %p2186_p13 = pneg %p2185_p12 }
 0x323   : > { %v1407_v13 = vadd.f32 %v1406_v63, %v2683_v60  ;;  %v1446_v14 = vadd.f32 %v1445_v0, %v1431_v54 }
 0x324   : > { %p2193_p3 = pnand %p2192_p2, %p2186_p13 }
 0x325   : > { %v1447_v19 = vadd.f32 %v1446_v14, %v1432_v15  ;;  %v1408_v9 = vadd.f32 %v1407_v13, %v2688_v62 }
 0x327   : > { %v1409_v21 = vadd.f32 %v1408_v9, %v2693_v18  ;;  %v1448_v5 = vadd.f32 %v1447_v19, %v1433_v16  ;;  %v1497_v9 = vlaneseq }
 0x329   : > { %v1410_v23 = vadd.f32 %v1409_v21, %v2698_v12  ;;  %v1449_v4 = vadd.f32 %v1448_v5, %v1434_v7  ;;  %v1498_v10 = vshrl.u32 %v1497_v9, 7 }
 0x32b   : > { %v1411_v2 = vadd.f32 %v1410_v23, %v2705_v8  ;;  %v1450_v29 = vadd.f32 %v1449_v4, %v1435_v6  ;;  %v1499_v7 = vsub.s32 0, %v1498_v10  ;;  %v1477_v6 = vld [vmem:[%s297_s21] sm:$0x1] }
 0x32d   : > { %v1412_v32 = vadd.f32 %v1411_v2, %v1379_v22  ;;  %v1451_v34 = vadd.f32 %v1450_v29, %v1436_v1 }
 0x32f   : > { %v1413_v37 = vadd.f32 %v1412_v32, %v2711_v25  ;;  %v1452_v38 = vadd.f32 %v1451_v34, %v1437_v33 }
 0x331   : > { %v1414_v40 = vadd.f32 %v1413_v37, %v2716_v31  ;;  %v1453_v41 = vadd.f32 %v1452_v38, %v1438_v35 }
 0x333   : > { %v1415_v42 = vrot.slane %v1414_v40, 4  ;;  %v1454_v44 = vadd.f32 %v1453_v41, %v1439_v39 }
 0x335   : > { %v1416_v45 = vadd.f32 %v1415_v42, %v1414_v40  ;;  %v1455_v46 = vrot.slane %v1454_v44, 4 }
 0x337   : > { %v1417_v47 = vrot.slane %v1416_v45, 2  ;;  %v1456_v48 = vadd.f32 %v1455_v46, %v1454_v44 }
 0x339   : > { %v1418_v50 = vadd.f32 %v1417_v47, %v1416_v45  ;;  %v1457_v52 = vrot.slane %v1456_v48, 2 }
 0x33b   : > { %v1419_v53 = vrot.slane %v1418_v50, 1  ;;  %v1458_v58 = vadd.f32 %v1457_v52, %v1456_v48 }
 0x33d   : > { %v1420_v61 = vadd.f32 %v1419_v53, %v1418_v50  ;;  %v1459_v55 = vrot.slane %v1458_v58, 1 }
 0x33f   : > { %v1421_v57 = vadd.f32 %v1420_v61, %v1399_v59  ;;  %v1460_v54 = vadd.f32 %v1459_v55, %v1458_v58 }
 0x341   : > { %1422 = vst [vmem:[#allocation3] sm:$0x1] %v1421_v57  ;;  %v1461_v63 = vadd.f32 %v1460_v54, %v1423_v56 }
 0x343   : > { %1462 = vst [vmem:[#allocation4] sm:$0x1] %v1461_v63 }
 0x348   : > { %v1466_v0 = vld [vmem:[#allocation3] sm:$0x1] }
 0x349   : > { %v1467_v17 = vmul.f32 0.0625, %v1466_v0 }
 0x34a   : > { %v1468_v15 = vld [vmem:[#allocation4] sm:$0x1] }
 0x34b   : > { %v1469_v13 = vmul.f32 0.0625, %v1468_v15  ;;  %v1470_v14 = vmul.f32 %v1467_v17, %v1467_v17 }
 0x34d   : > { %v1471_v11 = vsub.f32 %v1469_v13, %v1470_v14 }
 0x34f   : > { %v1472_v16 = vmax.f32 %v1471_v11, 0.0 }
 0x351   : > { %v1473_v19 = vadd.f32 1e-05, %v1472_v16 }
 0x353   : > { %2153 = vrsqrt.f32 %v1473_v19 }
 0x360   : > { %v2154_v21 = vpop.eup %2153 }
 0x361   : > { %v1476_v5 = vmul.f32 %v2154_v21, %v1475_v20 }
 0x363   : > { %v1478_v23 = vmul.f32 %v1476_v5, %v1467_v17  ;;  %v1500_v4 = vrot.slane %v1476_v5, %v1499_v7 }
 0x365   : > { %v1479_v24 = vsub.f32 %v1477_v6, %v1478_v23  ;;  %v1515_v1 = vmul.f32 %v1500_v4, %v1379_v22  ;;  %v1502_v2 = vmul.f32 %v1500_v4, %v2649_v3  ;;  %v1503_v29 = vmul.f32 %v1500_v4, %v2653_v27 }
 0x366   : > { %v1504_v30 = vmul.f32 %v1500_v4, %v2651_v26  ;;  %v1505_v32 = vmul.f32 %v1500_v4, %v2657_v28  ;;  %v1506_v33 = vmul.f32 %v1500_v4, %v2666_v36  ;;  %v1507_v34 = vmul.f32 %v1500_v4, %v2676_v49 }
 0x367   : > { %v1522_v35 = vrot.slane %v1479_v24, %v1499_v7  ;;  %v1508_v37 = vmul.f32 %v1500_v4, %v2671_v43  ;;  %v1509_v38 = vmul.f32 %v1500_v4, %v2678_v51  ;;  %v1510_v39 = vmul.f32 %v1500_v4, %v2683_v60 }
 0x368   : > { %v1511_v22 = vmul.f32 %v1500_v4, %v2688_v62  ;;  %v1512_v3 = vmul.f32 %v1500_v4, %v2693_v18  ;;  %v1513_v27 = vmul.f32 %v1500_v4, %v2698_v12  ;;  %v1514_v26 = vmul.f32 %v1500_v4, %v2705_v8 }
 0x369   : > { %v1537_v28 = vadd.f32 %v1522_v35, %v1515_v1  ;;  %v1516_v36 = vmul.f32 %v1500_v4, %v2711_v25  ;;  %v1517_v49 = vmul.f32 %v1500_v4, %v2716_v31  ;;  %v1524_v40 = vadd.f32 %v1522_v35, %v1502_v2 }
 0x36a   : > { %v1525_v41 = vadd.f32 %v1522_v35, %v1503_v29  ;;  %v1526_v43 = vadd.f32 %v1522_v35, %v1504_v30  ;;  %v1527_v42 = vadd.f32 %v1522_v35, %v1505_v32  ;;  %v1528_v51 = vadd.f32 %v1522_v35, %v1506_v33 }
 0x36b   : > { %v1553_v44 = vmax.f32 %v1537_v28, 0.0  ;;  %v1529_v60 = vadd.f32 %v1522_v35, %v1507_v34  ;;  %v1530_v45 = vadd.f32 %v1522_v35, %v1508_v37  ;;  %v1531_v62 = vadd.f32 %v1522_v35, %v1509_v38 }
 0x36c   : > { %v1532_v46 = vadd.f32 %v1522_v35, %v1510_v39  ;;  %v1533_v18 = vadd.f32 %v1522_v35, %v1511_v22  ;;  %v1534_v47 = vadd.f32 %v1522_v35, %v1512_v3  ;;  %v1535_v12 = vadd.f32 %v1522_v35, %v1513_v27 }
 0x36d   : > { %1569 = vst [vmem:[#allocation8 + $0x68] sm:$0xff] %v1553_v44  ;;  %v1536_v8 = vadd.f32 %v1522_v35, %v1514_v26  ;;  %v1538_v48 = vadd.f32 %v1522_v35, %v1516_v36  ;;  %v1539_v50 = vadd.f32 %v1522_v35, %v1517_v49  ;;  %v1540_v25 = vmax.f32 %v1524_v40, 0.0 }
 0x36e   : > { %v1541_v31 = vmax.f32 %v1525_v41, 0.0  ;;  %v1542_v52 = vmax.f32 %v1526_v43, 0.0  ;;  %v1543_v53 = vmax.f32 %v1527_v42, 0.0  ;;  %v1544_v58 = vmax.f32 %v1528_v51, 0.0 }
 0x36f   : > { %v1545_v59 = vmax.f32 %v1529_v60, 0.0  ;;  %v1546_v61 = vmax.f32 %v1530_v45, 0.0  ;;  %v1547_v55 = vmax.f32 %v1531_v62, 0.0  ;;  %v1548_v56 = vmax.f32 %v1532_v46, 0.0  ;;  %1556 = vst [vmem:[#allocation8] sm:$0xff] %v1540_v25 }
 0x370   : > { %v1549_v57 = vmax.f32 %v1533_v18, 0.0  ;;  %v1550_v54 = vmax.f32 %v1534_v47, 0.0  ;;  %v1551_v63 = vmax.f32 %v1535_v12, 0.0  ;;  %v1552_v0 = vmax.f32 %v1536_v8, 0.0  ;;  %1557 = vst [vmem:[#allocation8 + $0x8] sm:$0xff] %v1541_v31  ;;  %1558 = vst [vmem:[#allocation8 + $0x10] sm:$0xff] %v1542_v52 }
 0x371   : > { %1559 = vst [vmem:[#allocation8 + $0x18] sm:$0xff] %v1543_v53  ;;  %1560 = vst [vmem:[#allocation8 + $0x20] sm:$0xff] %v1544_v58  ;;  %v1554_v17 = vmax.f32 %v1538_v48, 0.0  ;;  %v1555_v15 = vmax.f32 %v1539_v50, 0.0 }
 0x372   : > { %1561 = vst [vmem:[#allocation8 + $0x28] sm:$0xff] %v1545_v59  ;;  %1562 = vst [vmem:[#allocation8 + $0x30] sm:$0xff] %v1546_v61 }
 0x373   : > { %1563 = vst [vmem:[#allocation8 + $0x38] sm:$0xff] %v1547_v55  ;;  %1564 = vst [vmem:[#allocation8 + $0x40] sm:$0xff] %v1548_v56 }
 0x374   : > { %1565 = vst [vmem:[#allocation8 + $0x48] sm:$0xff] %v1549_v57  ;;  %1566 = vst [vmem:[#allocation8 + $0x50] sm:$0xff] %v1550_v54 }
 0x375   : > { %1567 = vst [vmem:[#allocation8 + $0x58] sm:$0xff] %v1551_v63  ;;  %1568 = vst [vmem:[#allocation8 + $0x60] sm:$0xff] %v1552_v0 }
 0x376   : > { %1570 = vst [vmem:[#allocation8 + $0x70] sm:$0xff] %v1554_v17  ;;  %1571 = vst [vmem:[#allocation8 + $0x78] sm:$0xff] %v1555_v15 }
 0x377   : > { %2196 = shalt.err (!%p2193_p3)
}
 0x378   : > { %s2271_s27 = smov 128   ;;  %s2272_s7 = smov 8  }
 0x379   : > { %2064 = dma.vmem_to_hbm [thread:$0]  (%p2751_p10), %s1579_s18, 2048, %s2790_s6, [#allocation7], %s2271_s27, %s2271_s27, %s2272_s7  }
 0x37a   : > { %2236 = dma.done.wait (%p2751_p10), [#allocation7], 2048  }
 0x37b   : > { %2238 = vsyncadd (%p2751_p10), [#allocation7], 4294965248 }
 0x37c PF: > { %s20_s26 = sadd.s32 1, %s2261_s26   ;;  %s2795_s21 = smov %s2245_s22 }
 0x37d   : > { %p17_p4 = scmp.ge.s32.totalorder %s20_s26, 5   ;;  %s2796_s22 = smov %s2249_s23 }
 0x37e   : > { %s2797_s23 = smov %s2359_s9  ;;  %s2798_s24 = smov %s2257_s25 }
 0x37f   : > { %s2799_s25 = smov %s2801_s28  ;;  %19 = sbr.rel (!%p17_p4) target bundleno = 5 (0x5), region = 106 }
 0x384   :  { %1594 = vsyncpa [#allocation6], 1 }
 0x385   :  { %1596 = vsyncpa [#allocation6 + $0x1], 1 }
 0x386   :  { %1597 = vsyncpa [#allocation7], 1 }
 0x387   :  { %1599 = vsyncpa [#allocation7 + $0x1], 1 }

</bundles_post_ra>
